<compile_context>
chip_gen: v6e
topology: v6e:2x2x1
jax: 0.10.0
libtpu: 0.0.40
codegen_flags: <defaults>
</compile_context>

<pallas_src>
import functools

import jax
import jax.numpy as jnp
from jax.experimental import pallas as pl
from jax.experimental.pallas import tpu as pltpu


# ----------------------------------------------------------------------------
# Fused GhostModule kernel: one grid step == Nb images, layout (C, H*W)
# ----------------------------------------------------------------------------
def _ghost_kernel(x_ref, wpw_ref, bpw_ref, wdw_ref, bdw_ref, o_ref, *, H, W, relu):
    nb, cin, HW = x_ref.shape
    c_init = wpw_ref.shape[0]
    c_keep = o_ref.shape[1] - c_init        # channels kept from the "cheap" branch

    # --- boundary masks for the 3x3 depthwise conv on the flattened lane axis ---
    # lane p = h*W + w ; neighbour (h+dr, w+dc) lives at lane p + dr*W + dc.
    p = jax.lax.broadcasted_iota(jnp.int32, (1, HW), 1)
    col = p % W
    m_l = col > 0                    # (h, w-1) in bounds
    m_r = col < (W - 1)              # (h, w+1) in bounds
    m_u = p >= W                     # (h-1, w) in bounds
    m_d = p < (H - 1) * W            # (h+1, w) in bounds

    def f32(m):
        return m.astype(jnp.float32)

    tap_mask = {
        (-1, -1): f32(m_u & m_l), (-1, 0): f32(m_u), (-1, 1): f32(m_u & m_r),
        (0, -1):  f32(m_l),                          (0, 1):  f32(m_r),
        (1, -1):  f32(m_d & m_l), (1, 0):  f32(m_d), (1, 1):  f32(m_d & m_r),
    }

    wpw = wpw_ref[...].astype(jnp.bfloat16)      # (c_init, Cin)  bf16 MXU operand
    bpw = bpw_ref[...]                           # (c_init, 1)    folded-BN bias
    bdw = bdw_ref[...]                           # (c_init, 1)    folded-BN bias
    wtaps = [wdw_ref[k] for k in range(9)]       # 9 x (c_init, 1) depthwise taps

    for n in range(nb):                          # static unroll over the batch block
        # ---- primary_conv: 1x1 conv == (c_init,Cin)@(Cin,HW) + folded BN + ReLU -
        x = x_ref[n].astype(jnp.bfloat16)                       # (Cin, HW)
        x1 = jnp.dot(wpw, x, preferred_element_type=jnp.float32) + bpw
        if relu:
            x1 = jnp.maximum(x1, 0.0)
        o_ref[n, :c_init, :] = x1.astype(o_ref.dtype)           # full-lane store

        # ---- cheap_operation: depthwise 3x3 via lane rolls + masks + BN + ReLU --
        acc = x1 * wtaps[4]                                     # centre tap (1,1)
        for dr in (-1, 0, 1):
            for dc in (-1, 0, 1):
                if dr == 0 and dc == 0:
                    continue
                d = dr * W + dc
                shifted = pltpu.roll(x1, shift=(-d) % HW, axis=1)   # x1 at lane p+d
                acc = acc + shifted * tap_mask[(dr, dc)] * wtaps[3 * (dr + 1) + (dc + 1)]
        x2 = acc + bdw
        if relu:
            x2 = jnp.maximum(x2, 0.0)
        o_ref[n, c_init:, :] = x2[:c_keep, :].astype(o_ref.dtype)


def _pick_batch_block(n, cin, oup, hw, target_bytes=1 << 20):
    per_image = (cin + oup) * hw * 4              # f32 in + out bytes per image
    nb = max(1, min(n, target_bytes // max(per_image, 1)))
    nb = min(nb, 8)                               # bound the in-kernel unroll
    nb = min(nb, max(1, (n + 1) // 2))            # keep >=2 grid steps when possible
    while n % nb != 0:                            # block must divide the batch
        nb -= 1
    return nb


def ghost_module_forward(x_nchw, params, relu=True):
    N, cin, H, W = x_nchw.shape
    c_init = params["pw_w"].shape[0]
    oup = int(params["oup"])
    c_keep = oup - c_init
    assert 0 < c_keep <= c_init, "ratio=2 GhostModule expected"
    HW = H * W

    x = x_nchw.reshape(N, cin, HW)                # free reshape, stays channels-major
    nb = _pick_batch_block(N, cin, oup, HW)

    out = pl.pallas_call(
        functools.partial(_ghost_kernel, H=H, W=W, relu=relu),
        out_shape=jax.ShapeDtypeStruct((N, oup, HW), jnp.float32),
        grid_spec=pltpu.PrefetchScalarGridSpec(
            num_scalar_prefetch=0,
            grid=(N // nb,),
            in_specs=[
                pl.BlockSpec((nb, cin, HW), lambda i: (i, 0, 0)),
                pl.BlockSpec((c_init, cin), lambda i: (0, 0)),
                pl.BlockSpec((c_init, 1), lambda i: (0, 0)),
                pl.BlockSpec((9, c_init, 1), lambda i: (0, 0, 0)),
                pl.BlockSpec((c_init, 1), lambda i: (0, 0)),
            ],
            out_specs=pl.BlockSpec((nb, oup, HW), lambda i: (i, 0, 0)),
        ),
        compiler_params=pltpu.CompilerParams(
            dimension_semantics=("parallel",),
            vmem_limit_bytes=32 * 1024 * 1024,    # explicit, safe on v5e/v6e/v7x
        ),
    )(x, params["pw_w"], params["pw_b"], params["dw_w"], params["dw_b"])

    return out.reshape(N, oup, H, W)              # free reshape back to NCHW


# ----------------------------------------------------------------------------
# Parameter setup (deterministic, synthetic) with eval-mode BN folding
# ----------------------------------------------------------------------------
def _fold_bn(w, gamma, beta, mean, var, eps=1e-5):
    s = gamma / jnp.sqrt(var + eps)
    return w * s.reshape(-1, *([1] * (w.ndim - 1))), beta - mean * s


def init_ghost_params(key, inp, oup, ratio=2, dw_size=3):
    assert ratio == 2 and dw_size == 3   # TODO(synk): only module defaults supported
    c_init = -(-oup // ratio)            # math.ceil(oup / ratio)
    c_new = c_init * (ratio - 1)
    ks = jax.random.split(key, 10)

    # primary_conv: Conv2d(inp, c_init, 1, bias=False) + BatchNorm2d(c_init)
    w = jax.random.normal(ks[0], (c_init, inp, 1, 1), jnp.float32) * 0.2
    gamma = jax.random.uniform(ks[1], (c_init,), jnp.float32, 0.5, 1.5)
    beta = jax.random.normal(ks[2], (c_init,), jnp.float32) * 0.1
    mean = jax.random.normal(ks[3], (c_init,), jnp.float32) * 0.1
    var = jax.random.uniform(ks[4], (c_init,), jnp.float32, 0.5, 1.5)
    wf, bf = _fold_bn(w, gamma, beta, mean, var)
    pw_w = wf[:, :, 0, 0]                            # (c_init, inp)  channels-major
    pw_b = bf.reshape(c_init, 1)

    # cheap_operation: Conv2d(c_init, c_new, 3, groups=c_init, bias=False) + BN(c_new)
    wd = jax.random.normal(ks[5], (c_new, 1, 3, 3), jnp.float32) * 0.2
    gamma = jax.random.uniform(ks[6], (c_new,), jnp.float32, 0.5, 1.5)
    beta = jax.random.normal(ks[7], (c_new,), jnp.float32) * 0.1
    mean = jax.random.normal(ks[8], (c_new,), jnp.float32) * 0.1
    var = jax.random.uniform(ks[9], (c_new,), jnp.float32, 0.5, 1.5)
    wdf, bdf = _fold_bn(wd, gamma, beta, mean, var)
    dw_w = jnp.transpose(wdf[:, 0, :, :], (1, 2, 0)).reshape(9, c_new, 1)  # [kh*3+kw, chan, 1]
    dw_b = bdf.reshape(c_new, 1)

    return {"pw_w": pw_w, "pw_b": pw_b, "dw_w": dw_w, "dw_b": dw_b, "oup": oup}


# ----------------------------------------------------------------------------
# Pure-JAX NCHW reference (same folded params) for a numerical sanity check
# ----------------------------------------------------------------------------
def ghost_module_reference(x_nchw, params, relu=True):
    x1 = jnp.einsum("oc,nchw->nohw", params["pw_w"], x_nchw)
    x1 = x1 + params["pw_b"].reshape(1, -1, 1, 1)
    if relu:
        x1 = jnp.maximum(x1, 0.0)
    N, C, H, W = x1.shape
    xp = jnp.pad(x1, ((0, 0), (0, 0), (1, 1), (1, 1)))
    wdw = params["dw_w"].reshape(3, 3, C)
    acc = jnp.zeros_like(x1)
    for kh in range(3):
        for kw in range(3):
            acc = acc + xp[:, :, kh:kh + H, kw:kw + W] * wdw[kh, kw].reshape(1, C, 1, 1)
    x2 = acc + params["dw_b"].reshape(1, -1, 1, 1)
    if relu:
        x2 = jnp.maximum(x2, 0.0)
    return jnp.concatenate([x1, x2], axis=1)[:, :params["oup"]]


# ----------------------------------------------------------------------------
if __name__ == "__main__":
    key = jax.random.PRNGKey(0)
    kx, kp = jax.random.split(key)

    N, INP, H, W = 2, 8, 16, 16        # input (NCHW); H*W = 256 lanes
    OUP = 16                           # init_channels = 8, new_channels = 8

    x = jax.random.normal(kx, (N, INP, H, W), jnp.float32)
    params = init_ghost_params(kp, INP, OUP)

    out = jax.block_until_ready(ghost_module_forward(x, params))
    ref = jax.block_until_ready(ghost_module_reference(x, params))

    assert out.shape == (N, OUP, H, W), out.shape
    assert bool(jnp.all(jnp.isfinite(out)))
    err = float(jnp.max(jnp.abs(out - ref)))
    # tolerance reflects bf16 MXU operands (f32 accumulation) vs. the f32 reference
    assert err < 5e-2, f"max abs diff vs reference = {err}"
    print("KERNEL_OK")
</pallas_src>

<mosaic_0001>
module attributes {stable_mosaic.version = 11 : i64} {
  func.func @_ghost_kernel(%arg0: i32, %arg1: memref<1x8x256xf32, #tpu.memory_space<vmem>>, %arg2: memref<8x8xf32, #tpu.memory_space<vmem>>, %arg3: memref<8x1xf32, #tpu.memory_space<vmem>>, %arg4: memref<9x8x1xf32, #tpu.memory_space<vmem>>, %arg5: memref<8x1xf32, #tpu.memory_space<vmem>>, %arg6: memref<1x16x256xf32, #tpu.memory_space<vmem>>) attributes {dimension_semantics = [#tpu.dimension_semantics<parallel>], iteration_bounds = array<i64: 2>, scalar_prefetch = 0 : i64, scratch_operands = 0 : i64, tpu.core_type = #tpu.core_type<tc>, window_params = [{transform_indices = @transform_0, window_bounds = array<i64: 1, 8, 256>}, {pipeline_mode = #tpu.pipeline_mode<synchronous>, transform_indices = @transform_1, window_bounds = array<i64: 8, 8>}, {pipeline_mode = #tpu.pipeline_mode<synchronous>, transform_indices = @transform_2, window_bounds = array<i64: 8, 1>}, {pipeline_mode = #tpu.pipeline_mode<synchronous>, transform_indices = @transform_3, window_bounds = array<i64: 9, 8, 1>}, {pipeline_mode = #tpu.pipeline_mode<synchronous>, transform_indices = @transform_4, window_bounds = array<i64: 8, 1>}, {transform_indices = @transform_5, window_bounds = array<i64: 1, 16, 256>}]} {
    %0 = tpu.iota {dimensions = array<i32: 1>} : vector<1x256xi32>
    %c16_i32 = arith.constant 16 : i32
    %c0_i32 = arith.constant 0 : i32
    %1 = arith.cmpi eq, %c16_i32, %c0_i32 : i32
    %c1_i32 = arith.constant 1 : i32
    %2 = arith.select %1, %c1_i32, %c16_i32 : i32
    %3 = vector.broadcast %2 : i32 to vector<1x256xi32>
    %4 = arith.remsi %0, %3 : vector<1x256xi32>
    %c0_i32_0 = arith.constant 0 : i32
    %5 = vector.broadcast %c0_i32_0 : i32 to vector<1x256xi32>
    %6 = arith.cmpi ne, %4, %5 : vector<1x256xi32>
    %c0_i32_1 = arith.constant 0 : i32
    %7 = vector.broadcast %c0_i32_1 : i32 to vector<1x256xi32>
    %8 = arith.cmpi slt, %4, %7 : vector<1x256xi32>
    %c0_i32_2 = arith.constant 0 : i32
    %9 = arith.cmpi slt, %2, %c0_i32_2 : i32
    %10 = vector.broadcast %9 : i1 to vector<1x256xi1>
    %11 = vector.broadcast %10 : vector<1x256xi1> to vector<1x256xi1>
    %12 = arith.xori %8, %11 : vector<1x256xi1>
    %13 = arith.andi %12, %6 : vector<1x256xi1>
    %14 = vector.broadcast %2 : i32 to vector<1x256xi32>
    %15 = arith.addi %4, %14 : vector<1x256xi32>
    %16 = arith.select %13, %15, %4 : vector<1x256xi1>, vector<1x256xi32>
    %c0_i32_3 = arith.constant 0 : i32
    %17 = vector.broadcast %c0_i32_3 : i32 to vector<1x256xi32>
    %18 = arith.cmpi sgt, %16, %17 : vector<1x256xi32>
    %c15_i32 = arith.constant 15 : i32
    %19 = vector.broadcast %c15_i32 : i32 to vector<1x256xi32>
    %20 = arith.cmpi slt, %16, %19 : vector<1x256xi32>
    %c16_i32_4 = arith.constant 16 : i32
    %21 = vector.broadcast %c16_i32_4 : i32 to vector<1x256xi32>
    %22 = arith.cmpi sge, %0, %21 : vector<1x256xi32>
    %c240_i32 = arith.constant 240 : i32
    %23 = vector.broadcast %c240_i32 : i32 to vector<1x256xi32>
    %24 = arith.cmpi slt, %0, %23 : vector<1x256xi32>
    %25 = arith.andi %22, %18 : vector<1x256xi1>
    %26 = arith.extui %25 : vector<1x256xi1> to vector<1x256xi32>
    %27 = arith.sitofp %26 : vector<1x256xi32> to vector<1x256xf32>
    %28 = arith.extui %22 : vector<1x256xi1> to vector<1x256xi32>
    %29 = arith.sitofp %28 : vector<1x256xi32> to vector<1x256xf32>
    %30 = arith.andi %22, %20 : vector<1x256xi1>
    %31 = arith.extui %30 : vector<1x256xi1> to vector<1x256xi32>
    %32 = arith.sitofp %31 : vector<1x256xi32> to vector<1x256xf32>
    %33 = arith.extui %18 : vector<1x256xi1> to vector<1x256xi32>
    %34 = arith.sitofp %33 : vector<1x256xi32> to vector<1x256xf32>
    %35 = arith.extui %20 : vector<1x256xi1> to vector<1x256xi32>
    %36 = arith.sitofp %35 : vector<1x256xi32> to vector<1x256xf32>
    %37 = arith.andi %24, %18 : vector<1x256xi1>
    %38 = arith.extui %37 : vector<1x256xi1> to vector<1x256xi32>
    %39 = arith.sitofp %38 : vector<1x256xi32> to vector<1x256xf32>
    %40 = arith.extui %24 : vector<1x256xi1> to vector<1x256xi32>
    %41 = arith.sitofp %40 : vector<1x256xi32> to vector<1x256xf32>
    %42 = arith.andi %24, %20 : vector<1x256xi1>
    %43 = arith.extui %42 : vector<1x256xi1> to vector<1x256xi32>
    %44 = arith.sitofp %43 : vector<1x256xi32> to vector<1x256xf32>
    %c0 = arith.constant 0 : index
    %c0_5 = arith.constant 0 : index
    %45 = vector.load %arg2[%c0, %c0_5] : memref<8x8xf32, #tpu.memory_space<vmem>>, vector<8x8xf32>
    %46 = arith.truncf %45 : vector<8x8xf32> to vector<8x8xbf16>
    %c0_6 = arith.constant 0 : index
    %c0_7 = arith.constant 0 : index
    %47 = vector.load %arg3[%c0_6, %c0_7] : memref<8x1xf32, #tpu.memory_space<vmem>>, vector<8x1xf32>
    %c0_8 = arith.constant 0 : index
    %c0_9 = arith.constant 0 : index
    %48 = vector.load %arg5[%c0_8, %c0_9] : memref<8x1xf32, #tpu.memory_space<vmem>>, vector<8x1xf32>
    %c0_10 = arith.constant 0 : index
    %c0_11 = arith.constant 0 : index
    %c0_12 = arith.constant 0 : index
    %49 = vector.load %arg4[%c0_10, %c0_11, %c0_12] : memref<9x8x1xf32, #tpu.memory_space<vmem>>, vector<1x8x1xf32>
    %50 = vector.shape_cast %49 : vector<1x8x1xf32> to vector<8x1xf32>
    %c1 = arith.constant 1 : index
    %c0_13 = arith.constant 0 : index
    %c0_14 = arith.constant 0 : index
    %51 = vector.load %arg4[%c1, %c0_13, %c0_14] : memref<9x8x1xf32, #tpu.memory_space<vmem>>, vector<1x8x1xf32>
    %52 = vector.shape_cast %51 : vector<1x8x1xf32> to vector<8x1xf32>
    %c2 = arith.constant 2 : index
    %c0_15 = arith.constant 0 : index
    %c0_16 = arith.constant 0 : index
    %53 = vector.load %arg4[%c2, %c0_15, %c0_16] : memref<9x8x1xf32, #tpu.memory_space<vmem>>, vector<1x8x1xf32>
    %54 = vector.shape_cast %53 : vector<1x8x1xf32> to vector<8x1xf32>
    %c3 = arith.constant 3 : index
    %c0_17 = arith.constant 0 : index
    %c0_18 = arith.constant 0 : index
    %55 = vector.load %arg4[%c3, %c0_17, %c0_18] : memref<9x8x1xf32, #tpu.memory_space<vmem>>, vector<1x8x1xf32>
    %56 = vector.shape_cast %55 : vector<1x8x1xf32> to vector<8x1xf32>
    %c4 = arith.constant 4 : index
    %c0_19 = arith.constant 0 : index
    %c0_20 = arith.constant 0 : index
    %57 = vector.load %arg4[%c4, %c0_19, %c0_20] : memref<9x8x1xf32, #tpu.memory_space<vmem>>, vector<1x8x1xf32>
    %58 = vector.shape_cast %57 : vector<1x8x1xf32> to vector<8x1xf32>
    %c5 = arith.constant 5 : index
    %c0_21 = arith.constant 0 : index
    %c0_22 = arith.constant 0 : index
    %59 = vector.load %arg4[%c5, %c0_21, %c0_22] : memref<9x8x1xf32, #tpu.memory_space<vmem>>, vector<1x8x1xf32>
    %60 = vector.shape_cast %59 : vector<1x8x1xf32> to vector<8x1xf32>
    %c6 = arith.constant 6 : index
    %c0_23 = arith.constant 0 : index
    %c0_24 = arith.constant 0 : index
    %61 = vector.load %arg4[%c6, %c0_23, %c0_24] : memref<9x8x1xf32, #tpu.memory_space<vmem>>, vector<1x8x1xf32>
    %62 = vector.shape_cast %61 : vector<1x8x1xf32> to vector<8x1xf32>
    %c7 = arith.constant 7 : index
    %c0_25 = arith.constant 0 : index
    %c0_26 = arith.constant 0 : index
    %63 = vector.load %arg4[%c7, %c0_25, %c0_26] : memref<9x8x1xf32, #tpu.memory_space<vmem>>, vector<1x8x1xf32>
    %64 = vector.shape_cast %63 : vector<1x8x1xf32> to vector<8x1xf32>
    %c8 = arith.constant 8 : index
    %c0_27 = arith.constant 0 : index
    %c0_28 = arith.constant 0 : index
    %65 = vector.load %arg4[%c8, %c0_27, %c0_28] : memref<9x8x1xf32, #tpu.memory_space<vmem>>, vector<1x8x1xf32>
    %66 = vector.shape_cast %65 : vector<1x8x1xf32> to vector<8x1xf32>
    %c0_29 = arith.constant 0 : index
    %c0_30 = arith.constant 0 : index
    %c0_31 = arith.constant 0 : index
    %67 = vector.load %arg1[%c0_29, %c0_30, %c0_31] : memref<1x8x256xf32, #tpu.memory_space<vmem>>, vector<1x8x256xf32>
    %68 = vector.shape_cast %67 : vector<1x8x256xf32> to vector<8x256xf32>
    %69 = arith.truncf %68 : vector<8x256xf32> to vector<8x256xbf16>
    %cst = arith.constant dense<0.000000e+00> : vector<8x256xf32>
    %70 = tpu.matmul %46, %69, %cst {dimension_numbers = #tpu.dot_dimension_numbers<[1], [0], [0], [1], [0, 0, 1, 1], [], []>} : vector<8x8xbf16>, vector<8x256xbf16>, vector<8x256xf32> -> vector<8x256xf32>
    %71 = vector.broadcast %47 : vector<8x1xf32> to vector<8x256xf32>
    %72 = arith.addf %70, %71 : vector<8x256xf32>
    %cst_32 = arith.constant 0.000000e+00 : f32
    %73 = vector.broadcast %cst_32 : f32 to vector<8x256xf32>
    %74 = arith.maximumf %72, %73 : vector<8x256xf32>
    %c0_33 = arith.constant 0 : index
    %c0_34 = arith.constant 0 : index
    %c0_35 = arith.constant 0 : index
    %75 = vector.load %arg6[%c0_33, %c0_34, %c0_35] : memref<1x16x256xf32, #tpu.memory_space<vmem>>, vector<1x8x256xf32>
    %76 = vector.shape_cast %75 : vector<1x8x256xf32> to vector<8x256xf32>
    %77 = vector.shape_cast %74 : vector<8x256xf32> to vector<1x8x256xf32>
    tpu.vector_store %arg6[%c0_33, %c0_34, %c0_35], %77 {strides = array<i32>} : memref<1x16x256xf32, #tpu.memory_space<vmem>>, vector<1x8x256xf32>,
    %78 = vector.broadcast %58 : vector<8x1xf32> to vector<8x256xf32>
    %79 = arith.mulf %74, %78 : vector<8x256xf32>
    %c17_i32 = arith.constant 17 : i32
    %80 = tpu.dynamic_rotate %74 by %c17_i32 dim 1 : vector<8x256xf32>, i32 -> vector<8x256xf32>
    %81 = vector.broadcast %27 : vector<1x256xf32> to vector<8x256xf32>
    %82 = arith.mulf %80, %81 : vector<8x256xf32>
    %83 = vector.broadcast %50 : vector<8x1xf32> to vector<8x256xf32>
    %84 = arith.mulf %82, %83 : vector<8x256xf32>
    %85 = arith.addf %79, %84 : vector<8x256xf32>
    %c16_i32_36 = arith.constant 16 : i32
    %86 = tpu.dynamic_rotate %74 by %c16_i32_36 dim 1 : vector<8x256xf32>, i32 -> vector<8x256xf32>
    %87 = vector.broadcast %29 : vector<1x256xf32> to vector<8x256xf32>
    %88 = arith.mulf %86, %87 : vector<8x256xf32>
    %89 = vector.broadcast %52 : vector<8x1xf32> to vector<8x256xf32>
    %90 = arith.mulf %88, %89 : vector<8x256xf32>
    %91 = arith.addf %85, %90 : vector<8x256xf32>
    %c15_i32_37 = arith.constant 15 : i32
    %92 = tpu.dynamic_rotate %74 by %c15_i32_37 dim 1 : vector<8x256xf32>, i32 -> vector<8x256xf32>
    %93 = vector.broadcast %32 : vector<1x256xf32> to vector<8x256xf32>
    %94 = arith.mulf %92, %93 : vector<8x256xf32>
    %95 = vector.broadcast %54 : vector<8x1xf32> to vector<8x256xf32>
    %96 = arith.mulf %94, %95 : vector<8x256xf32>
    %97 = arith.addf %91, %96 : vector<8x256xf32>
    %c1_i32_38 = arith.constant 1 : i32
    %98 = tpu.dynamic_rotate %74 by %c1_i32_38 dim 1 : vector<8x256xf32>, i32 -> vector<8x256xf32>
    %99 = vector.broadcast %34 : vector<1x256xf32> to vector<8x256xf32>
    %100 = arith.mulf %98, %99 : vector<8x256xf32>
    %101 = vector.broadcast %56 : vector<8x1xf32> to vector<8x256xf32>
    %102 = arith.mulf %100, %101 : vector<8x256xf32>
    %103 = arith.addf %97, %102 : vector<8x256xf32>
    %c255_i32 = arith.constant 255 : i32
    %104 = tpu.dynamic_rotate %74 by %c255_i32 dim 1 : vector<8x256xf32>, i32 -> vector<8x256xf32>
    %105 = vector.broadcast %36 : vector<1x256xf32> to vector<8x256xf32>
    %106 = arith.mulf %104, %105 : vector<8x256xf32>
    %107 = vector.broadcast %60 : vector<8x1xf32> to vector<8x256xf32>
    %108 = arith.mulf %106, %107 : vector<8x256xf32>
    %109 = arith.addf %103, %108 : vector<8x256xf32>
    %c241_i32 = arith.constant 241 : i32
    %110 = tpu.dynamic_rotate %74 by %c241_i32 dim 1 : vector<8x256xf32>, i32 -> vector<8x256xf32>
    %111 = vector.broadcast %39 : vector<1x256xf32> to vector<8x256xf32>
    %112 = arith.mulf %110, %111 : vector<8x256xf32>
    %113 = vector.broadcast %62 : vector<8x1xf32> to vector<8x256xf32>
    %114 = arith.mulf %112, %113 : vector<8x256xf32>
    %115 = arith.addf %109, %114 : vector<8x256xf32>
    %c240_i32_39 = arith.constant 240 : i32
    %116 = tpu.dynamic_rotate %74 by %c240_i32_39 dim 1 : vector<8x256xf32>, i32 -> vector<8x256xf32>
    %117 = vector.broadcast %41 : vector<1x256xf32> to vector<8x256xf32>
    %118 = arith.mulf %116, %117 : vector<8x256xf32>
    %119 = vector.broadcast %64 : vector<8x1xf32> to vector<8x256xf32>
    %120 = arith.mulf %118, %119 : vector<8x256xf32>
    %121 = arith.addf %115, %120 : vector<8x256xf32>
    %c239_i32 = arith.constant 239 : i32
    %122 = tpu.dynamic_rotate %74 by %c239_i32 dim 1 : vector<8x256xf32>, i32 -> vector<8x256xf32>
    %123 = vector.broadcast %44 : vector<1x256xf32> to vector<8x256xf32>
    %124 = arith.mulf %122, %123 : vector<8x256xf32>
    %125 = vector.broadcast %66 : vector<8x1xf32> to vector<8x256xf32>
    %126 = arith.mulf %124, %125 : vector<8x256xf32>
    %127 = arith.addf %121, %126 : vector<8x256xf32>
    %128 = vector.broadcast %48 : vector<8x1xf32> to vector<8x256xf32>
    %129 = arith.addf %127, %128 : vector<8x256xf32>
    %cst_40 = arith.constant 0.000000e+00 : f32
    %130 = vector.broadcast %cst_40 : f32 to vector<8x256xf32>
    %131 = arith.maximumf %129, %130 : vector<8x256xf32>
    %c0_41 = arith.constant 0 : index
    %c8_42 = arith.constant 8 : index
    %c0_43 = arith.constant 0 : index
    %132 = vector.load %arg6[%c0_41, %c8_42, %c0_43] : memref<1x16x256xf32, #tpu.memory_space<vmem>>, vector<1x8x256xf32>
    %133 = vector.shape_cast %132 : vector<1x8x256xf32> to vector<8x256xf32>
    %134 = vector.shape_cast %131 : vector<8x256xf32> to vector<1x8x256xf32>
    tpu.vector_store %arg6[%c0_41, %c8_42, %c0_43], %134 {strides = array<i32>} : memref<1x16x256xf32, #tpu.memory_space<vmem>>, vector<1x8x256xf32>,
    return
  }
  func.func @transform_0(%arg0: i32) -> (i32, i32, i32) {
    %c0_i32 = arith.constant 0 : i32
    %c0_i32_0 = arith.constant 0 : i32
    %c0_i32_1 = arith.constant 0 : i32
    return %arg0, %c0_i32, %c0_i32_0 : i32, i32, i32
  }
  func.func @transform_1(%arg0: i32) -> (i32, i32) {
    %c0_i32 = arith.constant 0 : i32
    %c0_i32_0 = arith.constant 0 : i32
    %c0_i32_1 = arith.constant 0 : i32
    return %c0_i32, %c0_i32_0 : i32, i32
  }
  func.func @transform_2(%arg0: i32) -> (i32, i32) {
    %c0_i32 = arith.constant 0 : i32
    %c0_i32_0 = arith.constant 0 : i32
    %c0_i32_1 = arith.constant 0 : i32
    return %c0_i32, %c0_i32_0 : i32, i32
  }
  func.func @transform_3(%arg0: i32) -> (i32, i32, i32) {
    %c0_i32 = arith.constant 0 : i32
    %c0_i32_0 = arith.constant 0 : i32
    %c0_i32_1 = arith.constant 0 : i32
    %c0_i32_2 = arith.constant 0 : i32
    return %c0_i32, %c0_i32_0, %c0_i32_1 : i32, i32, i32
  }
  func.func @transform_4(%arg0: i32) -> (i32, i32) {
    %c0_i32 = arith.constant 0 : i32
    %c0_i32_0 = arith.constant 0 : i32
    %c0_i32_1 = arith.constant 0 : i32
    return %c0_i32, %c0_i32_0 : i32, i32
  }
  func.func @transform_5(%arg0: i32) -> (i32, i32, i32) {
    %c0_i32 = arith.constant 0 : i32
    %c0_i32_0 = arith.constant 0 : i32
    %c0_i32_1 = arith.constant 0 : i32
    return %arg0, %c0_i32, %c0_i32_0 : i32, i32, i32
  }
}

</mosaic_0001>

<bundles_post_ra>
// kernel: tpu_custom_call.1
= control target key start
LH: loop header
LB: loop body
LE: loop exit
PB: predicated region body
PF: predicated region fallthrough
CT: control target
= control target key end

     0   :  { %10 = vsyncpa [#allocation3], 0  ;;  %s1126_s0 = inlined_call_operand.vmem [shape: f32[2,8,256], index: 0, kind: input, shape index: {}]   ;;  %s1127_s1 = inlined_call_operand.vmem [shape: f32[8,8], index: 1, kind: input, shape index: {}]   ;;  %s1128_s2 = inlined_call_operand.vmem [shape: f32[8,1], index: 2, kind: input, shape index: {}]   ;;  %s1129_s3 = inlined_call_operand.vmem [shape: f32[9,8,1], index: 3, kind: input, shape index: {}]   ;;  %s1130_s4 = inlined_call_operand.vmem [shape: f32[8,1], index: 4, kind: input, shape index: {}]   ;;  %s1131_s5 = inlined_call_operand.hbm [shape: f32[2,16,256], index: 5, kind: output, shape index: {}]  }
   0x1   :  { %12 = vsyncpa [#allocation3 + $0x1], 0  ;;  %s817_s18 = smov 0   ;;  %s819_s19 = smov 0  }
   0x2   :  { %s821_s20 = smov 0   ;;  %s823_s21 = smov 0  }
   0x3 LB: > { %s838_s22 = sadd.s32 4294967295, %s773_s21   ;;  %s623_s23 = sadd.s32 4294967294, %s773_s21   ;;  %s773_s21 = sphi %s823_s21, %s1145_s21   ;;  %s769_s20 = sphi %s821_s20, %s1144_s20   ;;  %s765_s19 = sphi %s819_s19, %s1143_s19   ;;  %s761_s18 = sphi %s817_s18, %s1142_s18  }
   0x4   : > { %s842_s24 = sadd.s32 1, %s773_s21   ;;  %s135_s25 = sadd.s32 1, %s769_s20 }
   0x5   : > { %s132_s26 = ssub.s32 %s773_s21, %s842_s24  ;;  %p145_p0 = scmp.ne.s32.totalorder %s769_s20, %s765_s19 }
   0x6   : > { %p133_p1 = scmp.eq.s32.totalorder %s132_s26, 0  ;;  %p146_p2 = scmp.eq.s32.totalorder %s838_s22, 1 }
   0x7   : > { %p151_p3 = scmp.ne.s32.totalorder %s765_s19, %s761_s18  ;;  %p152_p4 = scmp.eq.s32.totalorder %s623_s23, 1 }
   0x8   : > { %s853_s27 = scalar_select %p133_p1, %s769_s20, %s135_s25  }
   0x9   : > { %p855_p5 = por %p146_p2, %p145_p0  ;;  %p859_p6 = por %p152_p4, %p151_p3 }
   0xa   : > { %p626_p7 = scmp.ge.s32.totalorder %s773_s21, 1  ;;  %p190_p8 = scmp.lt.s32.totalorder %s773_s21, 3 }
   0xc   : > { %p191_p9 = pnand %p626_p7, %p190_p8 }
   0xd   : > { %p218_p10 = scmp.lt.s32.totalorder (!%p191_p9), %s838_s22, 1  ;;  %s215_s16 = sand.u32 (!%p191_p9), 1, %s765_s19  }
   0xe   : > { %194 = sbr.rel (%p191_p9) target bundleno = 401 (0x191), region = 40  ;;  %s776_s23 = smov (!%p191_p9), 16  }
   0xf   : > { %s777_s25 = smov (!%p191_p9), 17   ;;  %s778_s30 = smov (!%p191_p9), 1  }
  0x10   : > { %s779_s6 = smov (!%p191_p9), 15   ;;  %s781_s8 = smov (!%p191_p9), 127  }
  0x11   : > { %s782_s9 = smov (!%p191_p9), 111   ;;  %s783_s10 = smov (!%p191_p9), 112  }
  0x12   : > { %s660_s14 = sshll.u32 (!%p191_p9), %s838_s22, 9 }
  0x13   : > { %v301_v0 = vld [vmem:[%s1128_s2] sm:$0xff]  ;;  %v775_v1 = vmov 0   ;;  %s219_s7 = scalar_select %p218_p10, %s838_s22, 1  ;;  %v644_v4 = vld [vmem:[%s1129_s3 + $0x8] sm:$0xff]  ;;  %vm333_vm0 = vcmask 1043456   ;;  %v645_v10 = vld [vmem:[%s1129_s3 + $0x10] sm:$0xff]  ;;  %v224_v37 = vlaneseq }
  0x14   : > { %372 = vmatprep.mubr.bf16.mxu0 %v775_v1  ;;  %711 = vset.pattern.permute.xlu0 %v775_v1  ;;  %v303_v2 = vld [vmem:[%s1129_s3] sm:$0xff]  ;;  %v646_v11 = vld [vmem:[%s1129_s3 + $0x18] sm:$0xff]  ;;  %vm329_vm1 = vcmask 64512   ;;  %v648_v14 = vld [vmem:[%s1129_s3 + $0x28] sm:$0xff]  ;;  %v784_v53 = vmov 0.0  }
  0x15   : > { %326 = vperm.xlu0 %711, %v301_v0   ;;  %712 = vset.pattern.permute.xlu1 %v775_v1  ;;  %v647_v3 = vld [vmem:[%s1129_s3 + $0x20] sm:$0xff]  ;;  %s659_s12 = sshll.u32 %s219_s7, 4  ;;  %v649_v15 = vld [vmem:[%s1129_s3 + $0x30] sm:$0xff]  ;;  %v650_v16 = vld [vmem:[%s1129_s3 + $0x38] sm:$0xff]  ;;  %s780_s7 = smov 113   ;;  %v949_v40 = vand.u32 127, %v224_v37 }
  0x16   : > { %403 = vperm.xlu1 %712, %v303_v2   ;;  %s222_s17 = scalar_lea.vmem %s1126_s0, %s659_s12  ;;  %v299_v7 = vld [vmem:[%s1127_s1] sm:$0xff] }
  0x17   : > { %v321_v5 = vld [vmem:[%s222_s17 + $0x8] sm:$0xff]  ;;  %v320_v6 = vld [vmem:[%s222_s17] sm:$0xff]  ;;  %v300_v13 = vpack.c.bf16 %v299_v7, %v299_v7  ;;  %s627_s17 = sshll.u32 %s215_s16, 5  ;;  %v952_v43 = vadd.s32 128, %v949_v40  ;;  %v231_v44 = vand.u32 15, %v949_v40  ;;  %vm255_vm3 = vcmp.ge.s32.totalorder %v949_v40, 16 }
  0x18   : > { %v323_v8 = vpack.c.bf16 %v321_v5, %v321_v5  ;;  %v322_v9 = vpack.c.bf16 %v320_v6, %v320_v6  ;;  %v651_v17 = vld [vmem:[%s1129_s3 + $0x40] sm:$0xff]  ;;  %s913_s26 = scalar_lea.vmem [#allocation2], %s627_s17  ;;  %vm396_vm8 = vcmp.lt.s32.totalorder %v949_v40, 17  ;;  %vm414_vm9 = vcmp.lt.s32.totalorder %v949_v40, 16 }
  0x19   : > { %387 = vperm.xlu0 %711, %v647_v3   ;;  %v302_v27 = vld [vmem:[%s1130_s4] sm:$0xff]  ;;  %v238_v47 = vand.u32 15, %v952_v43  ;;  %vm960_vm2 = vcmp.gt.s32.totalorder %v231_v44, 0  ;;  %vm965_vm4 = vcmp.lt.s32.totalorder %v231_v44, 15  ;;  %v632_v57 = vsel %vm255_vm3, 1.0, %v784_v53  ;;  %s561_s13 = sshll.u32 %s913_s26, 4  ;;  %s1074_s13 = int_to_ptr.vmem [resolvable:$true] %s561_s13 }
  0x1a   : > { %421 = vperm.xlu1 %712, %v644_v4   ;;  %652 = vmatprep.subr.msk.bf16.mxu0 %vm333_vm0, %v323_v8  ;;  %v335_v12 = vsel %vm333_vm0, %v322_v9, 0  ;;  %vm259_vm5 = vmand %vm255_vm3, %vm960_vm2  ;;  %vm432_vm11 = vcmp.lt.s32.totalorder %v949_v40, 15  ;;  %vm450_vm12 = vcmp.lt.s32.totalorder %v949_v40, 1  ;;  %vm258_vm13 = vcmp.lt.s32.totalorder %v952_v43, 240  ;;  %s713_s22 = scalar_lea.vmem %s1074_s13, 512 }
  0x1b   : > { %355 = vmatpush1.bf16.msra.mxu0 %v335_v12  ;;  %vm975_vm6 = vcmp.gt.s32.totalorder %v238_v47, 0  ;;  %vm269_vm7 = vmand %vm255_vm3, %vm965_vm4  ;;  %v630_v54 = vsel %vm259_vm5, 1.0, %v784_v53  ;;  %vm990_vm10 = vcmp.lt.s32.totalorder %v238_v47, 15  ;;  %v635_v7 = vsel %vm960_vm2, 1.0, %v784_v53  ;;  %p714_p11 = scmp.ne.s32.totalorder %s1074_s13, %s713_s22 }
  0x1c   : > { %v631_v56 = vsel %vm975_vm6, 1.0, %v784_v53  ;;  %v633_v62 = vsel %vm269_vm7, 1.0, %v784_v53  ;;  %v634_v6 = vsel %vm990_vm10, 1.0, %v784_v53  ;;  %v1007_v8 = vsel %vm965_vm4, 1.0, %v784_v53  ;;  %vm284_vm0 = vmand %vm258_vm13, %vm975_vm6 }
  0x1d   : > { %439 = vperm.xlu0 %711, %v645_v10   ;;  %vm468_vm14 = vcmp.lt.s32.totalorder %v949_v40, 127  ;;  %vm486_vm15 = vcmp.lt.s32.totalorder %v949_v40, 113  ;;  %vm294_vm2 = vmand %vm258_vm13, %vm990_vm10  ;;  %vm522_vm3 = vcmp.lt.s32.totalorder %v949_v40, 111  ;;  %p715_p12 = pnand %p714_p11, %p855_p5 }
  0x1e   : > { %457 = vperm.xlu1 %712, %v646_v11   ;;  %653 = vmatmul.mubr.msk.bf16.vlgmr.msra.gmra.mxu0 %vm329_vm1, %v300_v13  ;;  %vm504_vm1 = vcmp.lt.s32.totalorder %v949_v40, 112 }
  0x1f   : > { %p716_p13 = pneg %p715_p12 }
  0x21   : > { %475 = vperm.xlu0 %711, %v648_v14  }
  0x22   : > { %493 = vperm.xlu1 %712, %v649_v15  }
  0x25   : > { %511 = vperm.xlu0 %711, %v650_v16  }
  0x26   : > { %529 = vperm.xlu1 %712, %v651_v17  }
  0x90   : > { %v327_v18 = vpop.permute.xlu0 %326 }
  0x91   : > { %v404_v28 = vpop.permute.xlu1 %403 }
  0x94   : > { %v388_v29 = vpop.permute.xlu0 %387 }
  0x95   : > { %v422_v30 = vpop.permute.xlu1 %421 }
  0x98   : > { %v937_v31 = vpop.permute.xlu0 %439 }
  0x99   : > { %v939_v32 = vpop.permute.xlu1 %457 }
  0x9c   : > { %v941_v33 = vpop.permute.xlu0 %475 }
  0x9d   : > { %v943_v34 = vpop.permute.xlu1 %493 }
  0xa0   : > { %v945_v35 = vpop.permute.xlu0 %511 }
  0xa1   : > { %v947_v36 = vpop.permute.xlu1 %529 }
  0xde   : > { %v374_v19 = vpop.f32.mrf.mxu0 }
  0xdf   : > { %v375_v20 = vadd.f32 %v374_v19, %v327_v18 }
  0xe0   : > { %v376_v21 = vpop.f32.mrf.mxu0 }
  0xe1   : > { %v906_v22 = vmax.f32 %v375_v20, 0.0  ;;  %v377_v23 = vadd.f32 %v376_v21, %v327_v18 }
  0xe2   : > { %v378_v24 = vpop.f32.mrf.mxu0 }
  0xe3   : > { %v908_v25 = vmax.f32 %v377_v23, 0.0  ;;  %410 = vrot.lane.b32.xlu0 %v906_v22, %s776_s23  ;;  %392 = vrot.lane.b32.xlu1 %v906_v22, %s777_s25  ;;  %383 = vst [vmem:[%s913_s26] sm:$0xff] %v906_v22  ;;  %v390_v55 = vmul.f32 %v388_v29, %v906_v22 }
  0xe4   : > { %v379_v26 = vpop.f32.mrf.mxu0 }
  0xe5   : > { %384 = vst [vmem:[%s913_s26 + $0x8] sm:$0xff] %v908_v25  ;;  %v391_v58 = vmul.f32 %v388_v29, %v908_v25 }
  0xe7   : > { %446 = vrot.lane.b32.xlu0 %v906_v22, %s778_s30  ;;  %428 = vrot.lane.b32.xlu1 %v906_v22, %s779_s6 }
  0xeb   : > { %482 = vrot.lane.b32.xlu0 %v906_v22, %s780_s7  ;;  %464 = vrot.lane.b32.xlu1 %v906_v22, %s781_s8 }
  0xef   : > { %518 = vrot.lane.b32.xlu0 %v906_v22, %s782_s9  ;;  %500 = vrot.lane.b32.xlu1 %v906_v22, %s783_s10 }
  0xf3   : > { %394 = vrot.lane.b32.xlu0 %v908_v25, %s777_s25  ;;  %412 = vrot.lane.b32.xlu1 %v908_v25, %s776_s23  ;;  %s1079_s25 = scalar_lea.hbm %s1131_s5, %s660_s14 }
  0xf7   : > { %430 = vrot.lane.b32.xlu0 %v908_v25, %s779_s6  ;;  %448 = vrot.lane.b32.xlu1 %v908_v25, %s778_s30  ;;  %s1085_s30 = scalar_lea.sflag [#allocation3], %s215_s16  ;;  %s785_s6 = smov [#allocation2]  }
  0xfb   : > { %466 = vrot.lane.b32.xlu0 %v908_v25, %s781_s8  ;;  %484 = vrot.lane.b32.xlu1 %v908_v25, %s780_s7  ;;  %s717_s7 = sshll.u32 %s785_s6, 4  ;;  %s718_s7 = int_to_ptr.vmem [resolvable:$false] %s717_s7 }
  0xfc   : > { %s719_s8 = scalar_lea.vmem %s718_s7, 1024  ;;  %p720_p0 = scmp.lt.s32.totalorder %s1074_s13, %s718_s7 }
  0xfd   : > { %p721_p1 = scmp.lt.s32.totalorder %s719_s8, %s713_s22 }
  0xff   : > { %502 = vrot.lane.b32.xlu0 %v908_v25, %s783_s10  ;;  %520 = vrot.lane.b32.xlu1 %v908_v25, %s782_s9  ;;  %v640_v25 = vsel %vm284_vm0, 1.0, %v784_v53  ;;  %p722_p2 = por %p721_p1, %p720_p0 }
 0x101   : > { %p723_p3 = pnand %p722_p2, %p716_p13 }
 0x103   : > { %538 = vperm.xlu0 %711, %v302_v27  }
 0x155   : > { %v411_v38 = vpop.permute.xlu0 %410  ;;  %v393_v39 = vpop.permute.xlu1 %392 }
 0x159   : > { %v447_v41 = vpop.permute.xlu0 %446  ;;  %v429_v42 = vpop.permute.xlu1 %428 }
 0x15d   : > { %v955_v45 = vpop.permute.xlu0 %482  ;;  %v957_v46 = vpop.permute.xlu1 %464 }
 0x161   : > { %v971_v50 = vpop.permute.xlu0 %518  ;;  %v973_v51 = vpop.permute.xlu1 %500 }
 0x165   : > { %v395_v60 = vpop.permute.xlu0 %394  ;;  %v413_v61 = vpop.permute.xlu1 %412 }
 0x166   : > { %v397_v63 = vsel %vm396_vm8, %v393_v39, %v395_v60  ;;  %v398_v0 = vsel %vm396_vm8, %v395_v60, %v393_v39  ;;  %v415_v1 = vsel %vm414_vm9, %v411_v38, %v413_v61  ;;  %v416_v2 = vsel %vm414_vm9, %v413_v61, %v411_v38 }
 0x167   : > { %v399_v3 = vmul.f32 %v630_v54, %v398_v0  ;;  %v400_v4 = vmul.f32 %v631_v56, %v397_v63  ;;  %v417_v5 = vmul.f32 %v632_v57, %v416_v2  ;;  %v425_v12 = vmul.f32 %v422_v30, %v415_v1 }
 0x168   : > { %v643_v61 = vsel %vm294_vm2, 1.0, %v784_v53 }
 0x169   : > { %v406_v9 = vmul.f32 %v404_v28, %v399_v3  ;;  %v407_v10 = vmul.f32 %v404_v28, %v400_v4  ;;  %v424_v11 = vmul.f32 %v422_v30, %v417_v5  ;;  %v431_v13 = vpop.permute.xlu0 %430  ;;  %v449_v14 = vpop.permute.xlu1 %448 }
 0x16a   : > { %v433_v15 = vsel %vm432_vm11, %v429_v42, %v431_v13  ;;  %v434_v16 = vsel %vm432_vm11, %v431_v13, %v429_v42  ;;  %v451_v17 = vsel %vm450_vm12, %v447_v41, %v449_v14  ;;  %v452_v18 = vsel %vm450_vm12, %v449_v14, %v447_v41 }
 0x16b   : > { %v408_v19 = vadd.f32 %v406_v9, %v390_v55  ;;  %v409_v20 = vadd.f32 %v407_v10, %v391_v58  ;;  %v435_v21 = vmul.f32 %v633_v62, %v434_v16  ;;  %v436_v22 = vmul.f32 %v634_v6, %v433_v15 }
 0x16c   : > { %v453_v23 = vmul.f32 %v635_v7, %v452_v18  ;;  %v454_v24 = vmul.f32 %v631_v56, %v451_v17 }
 0x16d   : > { %v426_v26 = vadd.f32 %v424_v11, %v408_v19  ;;  %v427_v27 = vadd.f32 %v425_v12, %v409_v20  ;;  %v442_v28 = vmul.f32 %v937_v31, %v435_v21  ;;  %v443_v29 = vmul.f32 %v937_v31, %v436_v22  ;;  %v467_v30 = vpop.permute.xlu0 %466  ;;  %v485_v37 = vpop.permute.xlu1 %484 }
 0x16e   : > { %v460_v38 = vmul.f32 %v939_v32, %v453_v23  ;;  %v461_v39 = vmul.f32 %v939_v32, %v454_v24  ;;  %v469_v41 = vsel %vm468_vm14, %v957_v46, %v467_v30  ;;  %v470_v42 = vsel %vm468_vm14, %v467_v30, %v957_v46 }
 0x16f   : > { %v444_v44 = vadd.f32 %v442_v28, %v426_v26  ;;  %v445_v47 = vadd.f32 %v443_v29, %v427_v27  ;;  %v471_v48 = vmul.f32 %v1007_v8, %v469_v41  ;;  %v472_v49 = vmul.f32 %v634_v6, %v470_v42 }
 0x170   : > { %v487_v31 = vsel %vm486_vm15, %v955_v45, %v485_v37  ;;  %v488_v32 = vsel %vm486_vm15, %v485_v37, %v955_v45  ;;  %v641_v46 = vsel %vm258_vm13, 1.0, %v784_v53 }
 0x171   : > { %v462_v52 = vadd.f32 %v460_v38, %v444_v44  ;;  %v463_v54 = vadd.f32 %v461_v39, %v445_v47  ;;  %v478_v55 = vmul.f32 %v941_v33, %v471_v48  ;;  %v479_v56 = vmul.f32 %v941_v33, %v472_v49  ;;  %v503_v57 = vpop.permute.xlu0 %502  ;;  %v521_v58 = vpop.permute.xlu1 %520 }
 0x172   : > { %v489_v59 = vmul.f32 %v635_v7, %v487_v31  ;;  %v490_v60 = vmul.f32 %v640_v25, %v488_v32  ;;  %v506_v45 = vsel %vm504_vm1, %v503_v57, %v973_v51  ;;  %v505_v63 = vsel %vm504_vm1, %v973_v51, %v503_v57 }
 0x173   : > { %v480_v43 = vadd.f32 %v478_v55, %v462_v52  ;;  %v481_v62 = vadd.f32 %v479_v56, %v463_v54  ;;  %v508_v0 = vmul.f32 %v641_v46, %v506_v45  ;;  %v523_v2 = vsel %vm522_vm3, %v971_v50, %v521_v58 }
 0x174   : > { %v496_v1 = vmul.f32 %v943_v34, %v489_v59  ;;  %v497_v33 = vmul.f32 %v943_v34, %v490_v60  ;;  %v524_v53 = vsel %vm522_vm3, %v521_v58, %v971_v50  ;;  %v514_v51 = vmul.f32 %v945_v35, %v505_v63 }
 0x175   : > { %v515_v3 = vmul.f32 %v945_v35, %v508_v0  ;;  %v525_v6 = vmul.f32 %v1007_v8, %v523_v2  ;;  %v526_v7 = vmul.f32 %v643_v61, %v524_v53 }
 0x176   : > { %v498_v4 = vadd.f32 %v496_v1, %v480_v43  ;;  %v499_v5 = vadd.f32 %v497_v33, %v481_v62 }
 0x177   : > { %v532_v10 = vmul.f32 %v947_v36, %v525_v6  ;;  %v533_v40 = vmul.f32 %v947_v36, %v526_v7 }
 0x178   : > { %v516_v34 = vadd.f32 %v514_v51, %v498_v4  ;;  %v517_v9 = vadd.f32 %v515_v3, %v499_v5 }
 0x17a   : > { %v534_v11 = vadd.f32 %v532_v10, %v516_v34  ;;  %v535_v50 = vadd.f32 %v533_v40, %v517_v9 }
 0x17e   : > { %v539_v12 = vpop.permute.xlu0 %538 }
 0x17f   : > { %v541_v13 = vadd.f32 %v539_v12, %v534_v11  ;;  %v542_v35 = vadd.f32 %v539_v12, %v535_v50 }
 0x181   : > { %v543_v8 = vmax.f32 %v541_v13, 0.0  ;;  %v544_v14 = vmax.f32 %v542_v35, 0.0 }
 0x183   : > { %545 = vst [vmem:[%s913_s26 + $0x10] sm:$0xff] %v543_v8  ;;  %546 = vst [vmem:[%s913_s26 + $0x18] sm:$0xff] %v544_v14 }
 0x184   : > { %726 = shalt.err (!%p723_p3)
}
 0x185   : > { %s727_s16 = scalar_lea.hbm %s1079_s25, 512  ;;  %s731_s10 = scalar_lea.hbm %s1131_s5, 1024 }
 0x186   : > { %p728_p4 = scmp.ne.s32.totalorder %s1079_s25, %s727_s16  ;;  %p732_p9 = scmp.lt.s32.totalorder %s1079_s25, %s1131_s5 }
 0x187   : > { %p733_p10 = scmp.lt.s32.totalorder %s731_s10, %s727_s16 }
 0x188   : > { %p729_p7 = pnand %p728_p4, %p855_p5 }
 0x189   : > { %p734_p11 = por %p733_p10, %p732_p9 }
 0x18a   : > { %p730_p8 = pneg %p729_p7 }
 0x18c   : > { %p735_p12 = pnand %p734_p11, %p730_p8 }
 0x18e   : > { %738 = shalt.err (!%p735_p12)
}
 0x18f   : > { %s786_s14 = smov 256  }
 0x190   : > { %661 = dma.vmem_to_hbm [thread:$0]  (%p855_p5), %s1074_s13, 512, %s1079_s25, %s1085_s30, %s786_s14, %s786_s14, %s776_s23  }
 0x191 PF: > { %p667_p13 = scmp.ge.s32.totalorder %s773_s21, 2  ;;  %s576_s15 = sand.u32 1, %s761_s18  }
 0x192   : > { %s577_s17 = scalar_lea.sflag [#allocation3], %s576_s15 }
 0x193   : > { %p664_p0 = pnand %p667_p13, %p859_p6 }
 0x195   : > { %p665_p1 = pneg %p664_p0 }
 0x197   : > { %756 = dma.done.wait (%p665_p1), %s577_s17, 512  }
 0x198   : > { %758 = vsyncadd (%p665_p1), %s577_s17, 4294966784  ;;  %p15_p2 = scmp.ge.s32.totalorder %s842_s24, 4   ;;  %s1142_s18 = smov %s765_s19 }
 0x199   : > { %s1143_s19 = smov %s769_s20  ;;  %s1144_s20 = smov %s853_s27 }
 0x19a   : > { %s1145_s21 = smov %s842_s24  ;;  %17 = sbr.rel (!%p15_p2) target bundleno = 3 (0x3), region = 83 }
 0x19f   :  { %582 = vsyncpa [#allocation3], 1 }
 0x1a0   :  { %584 = vsyncpa [#allocation3 + $0x1], 1 }

</bundles_post_ra>
